<compile_context>
chip_gen: v5e
topology: v5e:2x2
jax: 0.10.0
libtpu: 0.0.40
codegen_flags: <defaults>
</compile_context>

<pallas_src>
import functools
import math

import jax
import jax.numpy as jnp
from jax.experimental import pallas as pl
from jax.experimental.pallas import tpu as pltpu

EPS = 1e-5  # nn.LayerNorm default


def _layernorm(h, gamma, beta):
    mu = jnp.mean(h, axis=-1, keepdims=True)
    var = jnp.mean((h - mu) ** 2, axis=-1, keepdims=True)  # biased, like torch
    return (h - mu) * jax.lax.rsqrt(var + EPS) * gamma + beta


def contextnet_kernel(x_ref, c_ref,
                      w1x_ref, w1c_ref, b1_ref, g1_ref, be1_ref,
                      wa_ref, ba_ref, wb_ref, bb_ref,
                      w2_ref, b2_ref, g2_ref, be2_ref,
                      w3_ref, b3_ref,
                      o_ref):
    dd = w1x_ref.dtype  # matmul operand dtype (bf16), accumulate in f32

    x = x_ref[...].astype(dd)
    c = c_ref[...].astype(dd)

    # Linear(in_features + context_features -> 2*dim), concat fused as two dots.
    h = (jnp.dot(x, w1x_ref[...], preferred_element_type=jnp.float32)
         + jnp.dot(c, w1c_ref[...], preferred_element_type=jnp.float32)
         + b1_ref[...])
    # LayerNorm(2*dim) in f32
    h = _layernorm(h, g1_ref[...], be1_ref[...])

    # SwiGLU(2*dim, 2*dim): silu(linear1(h)) * linear2(h)
    hd = h.astype(dd)
    a = jnp.dot(hd, wa_ref[...], preferred_element_type=jnp.float32) + ba_ref[...]
    b = jnp.dot(hd, wb_ref[...], preferred_element_type=jnp.float32) + bb_ref[...]
    s = (a * jax.nn.sigmoid(a)) * b

    # Dropout(p=0.1): identity at inference time.
    # TODO(synk): training-mode dropout (pltpu.prng_seed + pltpu.prng_random_bits mask)
    #             not emitted here.

    # Linear(2*dim -> dim)
    h2 = jnp.dot(s.astype(dd), w2_ref[...], preferred_element_type=jnp.float32) + b2_ref[...]
    # LayerNorm(dim) in f32
    h2 = _layernorm(h2, g2_ref[...], be2_ref[...])

    # Linear(dim -> out_features)
    o_ref[...] = (jnp.dot(h2.astype(dd), w3_ref[...], preferred_element_type=jnp.float32)
                  + b3_ref[...]).astype(o_ref.dtype)


def init_params(key, in_features, out_features, context_features, dim):
    """Deterministic synthetic parameters in PyTorch layout: W is (out, in), b is (1, out)."""
    fin = in_features + context_features
    d2 = 2 * dim
    keys = jax.random.split(key, 8)

    def lin(k, o, i):
        kw, kb = jax.random.split(k)
        bound = 1.0 / jnp.sqrt(i)
        w = jax.random.uniform(kw, (o, i), jnp.float32, -bound, bound)
        b = jax.random.uniform(kb, (1, o), jnp.float32, -bound, bound)
        return w, b

    w1, b1 = lin(keys[0], d2, fin)
    g1, be1 = jnp.ones((1, d2), jnp.float32), jnp.zeros((1, d2), jnp.float32)
    wa, ba = lin(keys[1], d2, d2)
    wb, bb = lin(keys[2], d2, d2)
    w2, b2 = lin(keys[3], dim, d2)
    g2, be2 = jnp.ones((1, dim), jnp.float32), jnp.zeros((1, dim), jnp.float32)
    w3, b3 = lin(keys[4], out_features, dim)
    return (w1, b1, g1, be1, wa, ba, wb, bb, w2, b2, g2, be2, w3, b3)


def prepare_params(params, in_features, dot_dtype=jnp.bfloat16):
    """One-time host-side prep: PyTorch (out,in) -> MXU-friendly (in,out) bf16 weights,
    with W1 split column-wise so the x/context concat is fused into two dots.
    Biases / LayerNorm params stay f32."""
    (w1, b1, g1, be1, wa, ba, wb, bb, w2, b2, g2, be2, w3, b3) = params
    d2 = w1.shape[0]
    w1t = jnp.asarray(w1).T.astype(dot_dtype)          # (in + ctx, 2*dim)
    w1x = w1t[:in_features]
    if w1t.shape[0] - in_features > 0:
        w1c = w1t[in_features:]
    else:
        # context=None model: dummy zero context weights (8-wide K block).
        w1c = jnp.zeros((8, d2), dot_dtype)

    t = lambda w: jnp.asarray(w).T.astype(dot_dtype)
    return (w1x, w1c, b1, g1, be1,
            t(wa), ba, t(wb), bb,
            t(w2), b2, g2, be2,
            t(w3), b3)


@functools.partial(jax.jit, static_argnames=("block_b",))
def contextnet_forward(x, context, kparams, *, block_b=256):
    (w1x, w1c, b1, g1, be1, wa, ba, wb, bb, w2, b2, g2, be2, w3, b3) = kparams
    B = x.shape[0]
    if context is None:
        context = jnp.zeros((B, w1c.shape[0]), x.dtype)
    out_features = w3.shape[1]
    d2 = g1.shape[-1]

    # Batch tile: as large as requested (256 default), clamped to B, >= 8 sublanes.
    tb = max(8, min(block_b, B))
    Bp = math.ceil(B / tb) * tb
    if Bp != B:
        pad = Bp - B
        x = jnp.pad(x, ((0, pad), (0, 0)))
        context = jnp.pad(context, ((0, pad), (0, 0)))

    x_spec = pl.BlockSpec((tb, x.shape[1]), lambda i: (i, 0))
    c_spec = pl.BlockSpec((tb, context.shape[1]), lambda i: (i, 0))
    # Parameters are small, resident in VMEM (constant block index across the grid).
    param_specs = [pl.BlockSpec(p.shape, lambda i: (0, 0)) for p in kparams]
    # NOTE: for lane-dense stores, pick out_features (and dim) as multiples of 128/256
    # at model-config time; toy sizes here lower to masked stores.
    out_spec = pl.BlockSpec((tb, out_features), lambda i: (i, 0))

    # Explicit scoped-VMEM budget: double-buffered activation tiles + params + temps.
    tile_bytes = tb * (x.shape[1] + context.shape[1] + out_features) * 4
    param_bytes = sum(int(p.size) * p.dtype.itemsize for p in kparams)
    interm_bytes = 8 * tb * d2 * 4
    vmem_limit = int(min(max(2 * tile_bytes + 2 * param_bytes + interm_bytes + (4 << 20),
                             32 << 20),
                         64 << 20))  # cap at v7x physical VMEM
    # TODO(synk): for very large dim where 2x param bytes exceed the 64 MiB v7x budget,
    #             keep weights in memory_space=pl.ANY and stream K/N tiles with
    #             pltpu.emit_pipeline instead of replicating them per tile.

    out = pl.pallas_call(
        contextnet_kernel,
        out_shape=jax.ShapeDtypeStruct((Bp, out_features), jnp.float32),
        grid_spec=pltpu.PrefetchScalarGridSpec(
            num_scalar_prefetch=0,
            grid=(Bp // tb,),
            in_specs=[x_spec, c_spec] + param_specs,
            out_specs=out_spec,
        ),
        compiler_params=pltpu.CompilerParams(
            dimension_semantics=("parallel",),   # shards batch across v7x's 2 TCs
            vmem_limit_bytes=vmem_limit,
        ),
    )(x, context, *kparams)
    return out[:B] if Bp != B else out


def contextnet_reference(x, context, params, dot_dtype=jnp.bfloat16):
    """Pure-JAX reference mirroring the kernel numerics (bf16 dot operands, f32 accum/LN)."""
    (w1, b1, g1, be1, wa, ba, wb, bb, w2, b2, g2, be2, w3, b3) = params
    in_f = x.shape[-1]

    def mm(a, w_t):
        return jnp.dot(a.astype(dot_dtype), w_t.astype(dot_dtype),
                       preferred_element_type=jnp.float32)

    w1t = w1.T
    if context is not None:
        h = mm(x, w1t[:in_f]) + mm(context, w1t[in_f:]) + b1
    else:
        h = mm(x, w1t) + b1
    h = _layernorm(h, g1, be1)
    a = mm(h, wa.T) + ba
    b = mm(h, wb.T) + bb
    s = (a * jax.nn.sigmoid(a)) * b
    h2 = mm(s, w2.T) + b2
    h2 = _layernorm(h2, g2, be2)
    return mm(h2, w3.T) + b3


if __name__ == "__main__":
    in_features, context_features, out_features, dim = 6, 2, 4, 8
    B = 16

    key = jax.random.PRNGKey(0)
    kx, kc, kp = jax.random.split(key, 3)
    x = jax.random.normal(kx, (B, in_features), jnp.float32)
    context = jax.random.normal(kc, (B, context_features), jnp.float32)
    params = init_params(kp, in_features, out_features, context_features, dim)

    kparams = prepare_params(params, in_features)           # one-time weight prep
    out = contextnet_forward(x, context, kparams, block_b=256)
    out = jax.block_until_ready(out)

    ref = contextnet_reference(x, context, params)
    assert out.shape == (B, out_features)
    assert jnp.allclose(out, ref, atol=2e-3, rtol=2e-3), "mismatch vs reference"

    print("KERNEL_OK")
</pallas_src>

<mosaic_0001>
module attributes {stable_mosaic.version = 11 : i64} {
  func.func @contextnet_kernel(%arg0: i32, %arg1: memref<16x6xf32, #tpu.memory_space<vmem>>, %arg2: memref<16x2xf32, #tpu.memory_space<vmem>>, %arg3: memref<6x16xbf16, #tpu.memory_space<vmem>>, %arg4: memref<2x16xbf16, #tpu.memory_space<vmem>>, %arg5: memref<1x16xf32, #tpu.memory_space<vmem>>, %arg6: memref<1x16xf32, #tpu.memory_space<vmem>>, %arg7: memref<1x16xf32, #tpu.memory_space<vmem>>, %arg8: memref<16x16xbf16, #tpu.memory_space<vmem>>, %arg9: memref<1x16xf32, #tpu.memory_space<vmem>>, %arg10: memref<16x16xbf16, #tpu.memory_space<vmem>>, %arg11: memref<1x16xf32, #tpu.memory_space<vmem>>, %arg12: memref<16x8xbf16, #tpu.memory_space<vmem>>, %arg13: memref<1x8xf32, #tpu.memory_space<vmem>>, %arg14: memref<1x8xf32, #tpu.memory_space<vmem>>, %arg15: memref<1x8xf32, #tpu.memory_space<vmem>>, %arg16: memref<8x4xbf16, #tpu.memory_space<vmem>>, %arg17: memref<1x4xf32, #tpu.memory_space<vmem>>, %arg18: memref<16x4xf32, #tpu.memory_space<vmem>>) attributes {dimension_semantics = [#tpu.dimension_semantics<parallel>], iteration_bounds = array<i64: 1>, scalar_prefetch = 0 : i64, scratch_operands = 0 : i64, tpu.core_type = #tpu.core_type<tc>, window_params = [{transform_indices = @transform_0, window_bounds = array<i64: 16, 6>}, {transform_indices = @transform_1, window_bounds = array<i64: 16, 2>}, {pipeline_mode = #tpu.pipeline_mode<synchronous>, transform_indices = @transform_2, window_bounds = array<i64: 6, 16>}, {pipeline_mode = #tpu.pipeline_mode<synchronous>, transform_indices = @transform_3, window_bounds = array<i64: 2, 16>}, {pipeline_mode = #tpu.pipeline_mode<synchronous>, transform_indices = @transform_4, window_bounds = array<i64: 1, 16>}, {pipeline_mode = #tpu.pipeline_mode<synchronous>, transform_indices = @transform_5, window_bounds = array<i64: 1, 16>}, {pipeline_mode = #tpu.pipeline_mode<synchronous>, transform_indices = @transform_6, window_bounds = array<i64: 1, 16>}, {pipeline_mode = #tpu.pipeline_mode<synchronous>, transform_indices = @transform_7, window_bounds = array<i64: 16, 16>}, {pipeline_mode = #tpu.pipeline_mode<synchronous>, transform_indices = @transform_8, window_bounds = array<i64: 1, 16>}, {pipeline_mode = #tpu.pipeline_mode<synchronous>, transform_indices = @transform_9, window_bounds = array<i64: 16, 16>}, {pipeline_mode = #tpu.pipeline_mode<synchronous>, transform_indices = @transform_10, window_bounds = array<i64: 1, 16>}, {pipeline_mode = #tpu.pipeline_mode<synchronous>, transform_indices = @transform_11, window_bounds = array<i64: 16, 8>}, {pipeline_mode = #tpu.pipeline_mode<synchronous>, transform_indices = @transform_12, window_bounds = array<i64: 1, 8>}, {pipeline_mode = #tpu.pipeline_mode<synchronous>, transform_indices = @transform_13, window_bounds = array<i64: 1, 8>}, {pipeline_mode = #tpu.pipeline_mode<synchronous>, transform_indices = @transform_14, window_bounds = array<i64: 1, 8>}, {pipeline_mode = #tpu.pipeline_mode<synchronous>, transform_indices = @transform_15, window_bounds = array<i64: 8, 4>}, {pipeline_mode = #tpu.pipeline_mode<synchronous>, transform_indices = @transform_16, window_bounds = array<i64: 1, 4>}, {transform_indices = @transform_17, window_bounds = array<i64: 16, 4>}]} {
    %c0 = arith.constant 0 : index
    %c0_0 = arith.constant 0 : index
    %0 = vector.load %arg1[%c0, %c0_0] : memref<16x6xf32, #tpu.memory_space<vmem>>, vector<16x6xf32>
    %1 = arith.truncf %0 : vector<16x6xf32> to vector<16x6xbf16>
    %c0_1 = arith.constant 0 : index
    %c0_2 = arith.constant 0 : index
    %2 = vector.load %arg2[%c0_1, %c0_2] : memref<16x2xf32, #tpu.memory_space<vmem>>, vector<16x2xf32>
    %3 = arith.truncf %2 : vector<16x2xf32> to vector<16x2xbf16>
    %c0_3 = arith.constant 0 : index
    %c0_4 = arith.constant 0 : index
    %4 = vector.load %arg3[%c0_3, %c0_4] : memref<6x16xbf16, #tpu.memory_space<vmem>>, vector<6x16xbf16>
    %cst = arith.constant dense<0.000000e+00> : vector<16x16xf32>
    %5 = tpu.matmul %1, %4, %cst {dimension_numbers = #tpu.dot_dimension_numbers<[1], [0], [0], [1], [0, 0, 1, 1], [], []>} : vector<16x6xbf16>, vector<6x16xbf16>, vector<16x16xf32> -> vector<16x16xf32>
    %c0_5 = arith.constant 0 : index
    %c0_6 = arith.constant 0 : index
    %6 = vector.load %arg4[%c0_5, %c0_6] : memref<2x16xbf16, #tpu.memory_space<vmem>>, vector<2x16xbf16>
    %cst_7 = arith.constant dense<0.000000e+00> : vector<16x16xf32>
    %7 = tpu.matmul %3, %6, %cst_7 {dimension_numbers = #tpu.dot_dimension_numbers<[1], [0], [0], [1], [0, 0, 1, 1], [], []>} : vector<16x2xbf16>, vector<2x16xbf16>, vector<16x16xf32> -> vector<16x16xf32>
    %8 = arith.addf %5, %7 : vector<16x16xf32>
    %c0_8 = arith.constant 0 : index
    %c0_9 = arith.constant 0 : index
    %9 = vector.load %arg5[%c0_8, %c0_9] : memref<1x16xf32, #tpu.memory_space<vmem>>, vector<1x16xf32>
    %10 = vector.broadcast %9 : vector<1x16xf32> to vector<16x16xf32>
    %11 = arith.addf %8, %10 : vector<16x16xf32>
    %c0_10 = arith.constant 0 : index
    %c0_11 = arith.constant 0 : index
    %12 = vector.load %arg6[%c0_10, %c0_11] : memref<1x16xf32, #tpu.memory_space<vmem>>, vector<1x16xf32>
    %c0_12 = arith.constant 0 : index
    %c0_13 = arith.constant 0 : index
    %13 = vector.load %arg7[%c0_12, %c0_13] : memref<1x16xf32, #tpu.memory_space<vmem>>, vector<1x16xf32>
    %cst_14 = arith.constant dense<0.000000e+00> : vector<16xf32>
    %14 = vector.multi_reduction <add>, %11, %cst_14 [1] : vector<16x16xf32> to vector<16xf32>
    %15 = vector.shape_cast %14 : vector<16xf32> to vector<16x1xf32>
    %cst_15 = arith.constant 1.600000e+01 : f32
    %16 = vector.broadcast %cst_15 : f32 to vector<16x1xf32>
    %17 = arith.divf %15, %16 : vector<16x1xf32>
    %18 = vector.broadcast %17 : vector<16x1xf32> to vector<16x16xf32>
    %19 = arith.subf %11, %18 : vector<16x16xf32>
    %20 = arith.mulf %19, %19 : vector<16x16xf32>
    %cst_16 = arith.constant dense<0.000000e+00> : vector<16xf32>
    %21 = vector.multi_reduction <add>, %20, %cst_16 [1] : vector<16x16xf32> to vector<16xf32>
    %22 = vector.shape_cast %21 : vector<16xf32> to vector<16x1xf32>
    %cst_17 = arith.constant 1.600000e+01 : f32
    %23 = vector.broadcast %cst_17 : f32 to vector<16x1xf32>
    %24 = arith.divf %22, %23 : vector<16x1xf32>
    %25 = vector.broadcast %17 : vector<16x1xf32> to vector<16x16xf32>
    %26 = arith.subf %11, %25 : vector<16x16xf32>
    %cst_18 = arith.constant 9.99999974E-6 : f32
    %27 = vector.broadcast %cst_18 : f32 to vector<16x1xf32>
    %28 = arith.addf %24, %27 : vector<16x1xf32>
    %29 = math.rsqrt %28 : vector<16x1xf32>
    %30 = vector.broadcast %29 : vector<16x1xf32> to vector<16x16xf32>
    %31 = arith.mulf %26, %30 : vector<16x16xf32>
    %32 = vector.broadcast %12 : vector<1x16xf32> to vector<16x16xf32>
    %33 = arith.mulf %31, %32 : vector<16x16xf32>
    %34 = vector.broadcast %13 : vector<1x16xf32> to vector<16x16xf32>
    %35 = arith.addf %33, %34 : vector<16x16xf32>
    %36 = arith.truncf %35 : vector<16x16xf32> to vector<16x16xbf16>
    %c0_19 = arith.constant 0 : index
    %c0_20 = arith.constant 0 : index
    %37 = vector.load %arg8[%c0_19, %c0_20] : memref<16x16xbf16, #tpu.memory_space<vmem>>, vector<16x16xbf16>
    %cst_21 = arith.constant dense<0.000000e+00> : vector<16x16xf32>
    %38 = tpu.matmul %36, %37, %cst_21 {dimension_numbers = #tpu.dot_dimension_numbers<[1], [0], [0], [1], [0, 0, 1, 1], [], []>} : vector<16x16xbf16>, vector<16x16xbf16>, vector<16x16xf32> -> vector<16x16xf32>
    %c0_22 = arith.constant 0 : index
    %c0_23 = arith.constant 0 : index
    %39 = vector.load %arg9[%c0_22, %c0_23] : memref<1x16xf32, #tpu.memory_space<vmem>>, vector<1x16xf32>
    %40 = vector.broadcast %39 : vector<1x16xf32> to vector<16x16xf32>
    %41 = arith.addf %38, %40 : vector<16x16xf32>
    %c0_24 = arith.constant 0 : index
    %c0_25 = arith.constant 0 : index
    %42 = vector.load %arg10[%c0_24, %c0_25] : memref<16x16xbf16, #tpu.memory_space<vmem>>, vector<16x16xbf16>
    %cst_26 = arith.constant dense<0.000000e+00> : vector<16x16xf32>
    %43 = tpu.matmul %36, %42, %cst_26 {dimension_numbers = #tpu.dot_dimension_numbers<[1], [0], [0], [1], [0, 0, 1, 1], [], []>} : vector<16x16xbf16>, vector<16x16xbf16>, vector<16x16xf32> -> vector<16x16xf32>
    %c0_27 = arith.constant 0 : index
    %c0_28 = arith.constant 0 : index
    %44 = vector.load %arg11[%c0_27, %c0_28] : memref<1x16xf32, #tpu.memory_space<vmem>>, vector<1x16xf32>
    %45 = vector.broadcast %44 : vector<1x16xf32> to vector<16x16xf32>
    %46 = arith.addf %43, %45 : vector<16x16xf32>
    %47 = arith.negf %41 : vector<16x16xf32>
    %48 = math.exp %47 : vector<16x16xf32>
    %cst_29 = arith.constant 1.000000e+00 : f32
    %49 = vector.broadcast %cst_29 : f32 to vector<16x16xf32>
    %50 = arith.addf %49, %48 : vector<16x16xf32>
    %51 = arith.divf %49, %50 : vector<16x16xf32>
    %52 = arith.mulf %41, %51 : vector<16x16xf32>
    %53 = arith.mulf %52, %46 : vector<16x16xf32>
    %54 = arith.truncf %53 : vector<16x16xf32> to vector<16x16xbf16>
    %c0_30 = arith.constant 0 : index
    %c0_31 = arith.constant 0 : index
    %55 = vector.load %arg12[%c0_30, %c0_31] : memref<16x8xbf16, #tpu.memory_space<vmem>>, vector<16x8xbf16>
    %cst_32 = arith.constant dense<0.000000e+00> : vector<16x8xf32>
    %56 = tpu.matmul %54, %55, %cst_32 {dimension_numbers = #tpu.dot_dimension_numbers<[1], [0], [0], [1], [0, 0, 1, 1], [], []>} : vector<16x16xbf16>, vector<16x8xbf16>, vector<16x8xf32> -> vector<16x8xf32>
    %c0_33 = arith.constant 0 : index
    %c0_34 = arith.constant 0 : index
    %57 = vector.load %arg13[%c0_33, %c0_34] : memref<1x8xf32, #tpu.memory_space<vmem>>, vector<1x8xf32>
    %58 = vector.broadcast %57 : vector<1x8xf32> to vector<16x8xf32>
    %59 = arith.addf %56, %58 : vector<16x8xf32>
    %c0_35 = arith.constant 0 : index
    %c0_36 = arith.constant 0 : index
    %60 = vector.load %arg14[%c0_35, %c0_36] : memref<1x8xf32, #tpu.memory_space<vmem>>, vector<1x8xf32>
    %c0_37 = arith.constant 0 : index
    %c0_38 = arith.constant 0 : index
    %61 = vector.load %arg15[%c0_37, %c0_38] : memref<1x8xf32, #tpu.memory_space<vmem>>, vector<1x8xf32>
    %cst_39 = arith.constant dense<0.000000e+00> : vector<16xf32>
    %62 = vector.multi_reduction <add>, %59, %cst_39 [1] : vector<16x8xf32> to vector<16xf32>
    %63 = vector.shape_cast %62 : vector<16xf32> to vector<16x1xf32>
    %cst_40 = arith.constant 8.000000e+00 : f32
    %64 = vector.broadcast %cst_40 : f32 to vector<16x1xf32>
    %65 = arith.divf %63, %64 : vector<16x1xf32>
    %66 = vector.broadcast %65 : vector<16x1xf32> to vector<16x8xf32>
    %67 = arith.subf %59, %66 : vector<16x8xf32>
    %68 = arith.mulf %67, %67 : vector<16x8xf32>
    %cst_41 = arith.constant dense<0.000000e+00> : vector<16xf32>
    %69 = vector.multi_reduction <add>, %68, %cst_41 [1] : vector<16x8xf32> to vector<16xf32>
    %70 = vector.shape_cast %69 : vector<16xf32> to vector<16x1xf32>
    %cst_42 = arith.constant 8.000000e+00 : f32
    %71 = vector.broadcast %cst_42 : f32 to vector<16x1xf32>
    %72 = arith.divf %70, %71 : vector<16x1xf32>
    %73 = vector.broadcast %65 : vector<16x1xf32> to vector<16x8xf32>
    %74 = arith.subf %59, %73 : vector<16x8xf32>
    %cst_43 = arith.constant 9.99999974E-6 : f32
    %75 = vector.broadcast %cst_43 : f32 to vector<16x1xf32>
    %76 = arith.addf %72, %75 : vector<16x1xf32>
    %77 = math.rsqrt %76 : vector<16x1xf32>
    %78 = vector.broadcast %77 : vector<16x1xf32> to vector<16x8xf32>
    %79 = arith.mulf %74, %78 : vector<16x8xf32>
    %80 = vector.broadcast %60 : vector<1x8xf32> to vector<16x8xf32>
    %81 = arith.mulf %79, %80 : vector<16x8xf32>
    %82 = vector.broadcast %61 : vector<1x8xf32> to vector<16x8xf32>
    %83 = arith.addf %81, %82 : vector<16x8xf32>
    %84 = arith.truncf %83 : vector<16x8xf32> to vector<16x8xbf16>
    %c0_44 = arith.constant 0 : index
    %c0_45 = arith.constant 0 : index
    %85 = vector.load %arg16[%c0_44, %c0_45] : memref<8x4xbf16, #tpu.memory_space<vmem>>, vector<8x4xbf16>
    %cst_46 = arith.constant dense<0.000000e+00> : vector<16x4xf32>
    %86 = tpu.matmul %84, %85, %cst_46 {dimension_numbers = #tpu.dot_dimension_numbers<[1], [0], [0], [1], [0, 0, 1, 1], [], []>} : vector<16x8xbf16>, vector<8x4xbf16>, vector<16x4xf32> -> vector<16x4xf32>
    %c0_47 = arith.constant 0 : index
    %c0_48 = arith.constant 0 : index
    %87 = vector.load %arg17[%c0_47, %c0_48] : memref<1x4xf32, #tpu.memory_space<vmem>>, vector<1x4xf32>
    %88 = vector.broadcast %87 : vector<1x4xf32> to vector<16x4xf32>
    %89 = arith.addf %86, %88 : vector<16x4xf32>
    %c0_49 = arith.constant 0 : index
    %c0_50 = arith.constant 0 : index
    %90 = vector.load %arg18[%c0_49, %c0_50] : memref<16x4xf32, #tpu.memory_space<vmem>>, vector<16x4xf32>
    tpu.vector_store %arg18[%c0_49, %c0_50], %89 {strides = array<i32>} : memref<16x4xf32, #tpu.memory_space<vmem>>, vector<16x4xf32>,
    return
  }
  func.func @transform_0(%arg0: i32) -> (i32, i32) {
    %c0_i32 = arith.constant 0 : i32
    %c0_i32_0 = arith.constant 0 : i32
    return %arg0, %c0_i32 : i32, i32
  }
  func.func @transform_1(%arg0: i32) -> (i32, i32) {
    %c0_i32 = arith.constant 0 : i32
    %c0_i32_0 = arith.constant 0 : i32
    return %arg0, %c0_i32 : i32, i32
  }
  func.func @transform_2(%arg0: i32) -> (i32, i32) {
    %c0_i32 = arith.constant 0 : i32
    %c0_i32_0 = arith.constant 0 : i32
    %c0_i32_1 = arith.constant 0 : i32
    return %c0_i32, %c0_i32_0 : i32, i32
  }
  func.func @transform_3(%arg0: i32) -> (i32, i32) {
    %c0_i32 = arith.constant 0 : i32
    %c0_i32_0 = arith.constant 0 : i32
    %c0_i32_1 = arith.constant 0 : i32
    return %c0_i32, %c0_i32_0 : i32, i32
  }
  func.func @transform_4(%arg0: i32) -> (i32, i32) {
    %c0_i32 = arith.constant 0 : i32
    %c0_i32_0 = arith.constant 0 : i32
    %c0_i32_1 = arith.constant 0 : i32
    return %c0_i32, %c0_i32_0 : i32, i32
  }
  func.func @transform_5(%arg0: i32) -> (i32, i32) {
    %c0_i32 = arith.constant 0 : i32
    %c0_i32_0 = arith.constant 0 : i32
    %c0_i32_1 = arith.constant 0 : i32
    return %c0_i32, %c0_i32_0 : i32, i32
  }
  func.func @transform_6(%arg0: i32) -> (i32, i32) {
    %c0_i32 = arith.constant 0 : i32
    %c0_i32_0 = arith.constant 0 : i32
    %c0_i32_1 = arith.constant 0 : i32
    return %c0_i32, %c0_i32_0 : i32, i32
  }
  func.func @transform_7(%arg0: i32) -> (i32, i32) {
    %c0_i32 = arith.constant 0 : i32
    %c0_i32_0 = arith.constant 0 : i32
    %c0_i32_1 = arith.constant 0 : i32
    return %c0_i32, %c0_i32_0 : i32, i32
  }
  func.func @transform_8(%arg0: i32) -> (i32, i32) {
    %c0_i32 = arith.constant 0 : i32
    %c0_i32_0 = arith.constant 0 : i32
    %c0_i32_1 = arith.constant 0 : i32
    return %c0_i32, %c0_i32_0 : i32, i32
  }
  func.func @transform_9(%arg0: i32) -> (i32, i32) {
    %c0_i32 = arith.constant 0 : i32
    %c0_i32_0 = arith.constant 0 : i32
    %c0_i32_1 = arith.constant 0 : i32
    return %c0_i32, %c0_i32_0 : i32, i32
  }
  func.func @transform_10(%arg0: i32) -> (i32, i32) {
    %c0_i32 = arith.constant 0 : i32
    %c0_i32_0 = arith.constant 0 : i32
    %c0_i32_1 = arith.constant 0 : i32
    return %c0_i32, %c0_i32_0 : i32, i32
  }
  func.func @transform_11(%arg0: i32) -> (i32, i32) {
    %c0_i32 = arith.constant 0 : i32
    %c0_i32_0 = arith.constant 0 : i32
    %c0_i32_1 = arith.constant 0 : i32
    return %c0_i32, %c0_i32_0 : i32, i32
  }
  func.func @transform_12(%arg0: i32) -> (i32, i32) {
    %c0_i32 = arith.constant 0 : i32
    %c0_i32_0 = arith.constant 0 : i32
    %c0_i32_1 = arith.constant 0 : i32
    return %c0_i32, %c0_i32_0 : i32, i32
  }
  func.func @transform_13(%arg0: i32) -> (i32, i32) {
    %c0_i32 = arith.constant 0 : i32
    %c0_i32_0 = arith.constant 0 : i32
    %c0_i32_1 = arith.constant 0 : i32
    return %c0_i32, %c0_i32_0 : i32, i32
  }
  func.func @transform_14(%arg0: i32) -> (i32, i32) {
    %c0_i32 = arith.constant 0 : i32
    %c0_i32_0 = arith.constant 0 : i32
    %c0_i32_1 = arith.constant 0 : i32
    return %c0_i32, %c0_i32_0 : i32, i32
  }
  func.func @transform_15(%arg0: i32) -> (i32, i32) {
    %c0_i32 = arith.constant 0 : i32
    %c0_i32_0 = arith.constant 0 : i32
    %c0_i32_1 = arith.constant 0 : i32
    return %c0_i32, %c0_i32_0 : i32, i32
  }
  func.func @transform_16(%arg0: i32) -> (i32, i32) {
    %c0_i32 = arith.constant 0 : i32
    %c0_i32_0 = arith.constant 0 : i32
    %c0_i32_1 = arith.constant 0 : i32
    return %c0_i32, %c0_i32_0 : i32, i32
  }
  func.func @transform_17(%arg0: i32) -> (i32, i32) {
    %c0_i32 = arith.constant 0 : i32
    %c0_i32_0 = arith.constant 0 : i32
    return %arg0, %c0_i32 : i32, i32
  }
}

</mosaic_0001>

<bundles_post_ra>
// kernel: contextnet_forward.1
= control target key start
LH: loop header
LB: loop body
LE: loop exit
PB: predicated region body
PF: predicated region fallthrough
CT: control target
= control target key end

     0   :  { %vm69_vm0 = vcmask 1040384   ;;  %vm91_vm1 = vcmask 1042432   ;;  %vm65_vm2 = vcmask 15360   ;;  %vm87_vm3 = vcmask 48128   ;;  %s626_s3 = inlined_call_operand.vmem [shape: bf16[2,16], index: 3, kind: input, shape index: {}]   ;;  %s627_s2 = inlined_call_operand.vmem [shape: bf16[6,16], index: 2, kind: input, shape index: {}]   ;;  %s628_s1 = inlined_call_operand.vmem [shape: f32[16,2], index: 1, kind: input, shape index: {}]   ;;  %s629_s0 = inlined_call_operand.vmem [shape: f32[16,6], index: 0, kind: input, shape index: {}]   ;;  %s630_s4 = inlined_call_operand.vmem [shape: f32[1,16], index: 4, kind: input, shape index: {}]   ;;  %s631_s5 = inlined_call_operand.vmem [shape: f32[1,16], index: 5, kind: input, shape index: {}]   ;;  %s632_s6 = inlined_call_operand.vmem [shape: f32[1,16], index: 6, kind: input, shape index: {}]   ;;  %s633_s8 = inlined_call_operand.vmem [shape: f32[1,16], index: 8, kind: input, shape index: {}]   ;;  %s634_s7 = inlined_call_operand.vmem [shape: bf16[16,16], index: 7, kind: input, shape index: {}]   ;;  %s635_s9 = inlined_call_operand.vmem [shape: bf16[16,16], index: 9, kind: input, shape index: {}]   ;;  %s636_s10 = inlined_call_operand.vmem [shape: f32[1,16], index: 10, kind: input, shape index: {}]   ;;  %s637_s12 = inlined_call_operand.vmem [shape: f32[1,8], index: 12, kind: input, shape index: {}]   ;;  %s638_s11 = inlined_call_operand.vmem [shape: bf16[16,8], index: 11, kind: input, shape index: {}]   ;;  %s639_s13 = inlined_call_operand.vmem [shape: f32[1,8], index: 13, kind: input, shape index: {}]   ;;  %s640_s14 = inlined_call_operand.vmem [shape: f32[1,8], index: 14, kind: input, shape index: {}]   ;;  %s641_s16 = inlined_call_operand.vmem [shape: f32[1,4], index: 16, kind: input, shape index: {}]   ;;  %s642_s15 = inlined_call_operand.vmem [shape: bf16[8,4], index: 15, kind: input, shape index: {}]   ;;  %s643_s17 = inlined_call_operand.vmem [shape: f32[16,4], index: 17, kind: output, shape index: {}]  }
   0x1   :  { %644 = sst [smem:[#allocation2_spill]] %s626_s3  ;;  %v60_v2 = vld [vmem:[%s628_s1] sm:$0xff]  ;;  %v61_v5 = vld [vmem:[%s628_s1 + $0x8] sm:$0xff]  ;;  %vm117_vm4 = vcmask 130048   ;;  %v459_v21 = vmov 16.0  }
   0x2   :  { %645 = sst [smem:[#allocation3_spill]] %s627_s2  ;;  %v57_v6 = vld [vmem:[%s629_s0] sm:$0xff]  ;;  %v58_v7 = vld [vmem:[%s629_s0 + $0x8] sm:$0xff]  ;;  %v62_v8 = vpack.c.bf16 %v61_v5, %v60_v2  ;;  %439 = vrcp.f32 %v459_v21 }
   0x3   :  { %s646_s26 = sld [smem:[#allocation2_spill]]  ;;  %v59_v9 = vpack.c.bf16 %v58_v7, %v57_v6  ;;  %v430_v10 = vld [vmem:[%s630_s4] ss:$0 sm:$0xff] }
   0x4   :  { %s647_s29 = sld [smem:[#allocation3_spill]]  ;;  %v425_v38 = vld [vmem:[%s634_s7] sm:$0xff] }
   0x5   :  { %v426_v39 = vld [vmem:[%s635_s9] sm:$0xff]  ;;  %202 = vmatpush.bf16.msra.mxu2 %v425_v38 }
   0x6   :  { %228 = vmatpush.bf16.msra.mxu3 %v426_v39  ;;  %v431_v59 = vld [vmem:[%s631_s5] ss:$0 sm:$0xff] }
   0x7   :  { %v433_v5 = vld [vmem:[%s633_s8] ss:$0 sm:$0xff] }
   0x8   :  { %v440_v22 = vpop.eup %439 }
   0x9   :  { %v64_v0 = vld [vmem:[%s646_s26] sm:$0x1]  ;;  %v125_v23 = vmul.f32 16.0, %v440_v22  ;;  %vm129_vm5 = vweird.f32 %v440_v22 }
   0xa   :  { %v63_v1 = vld [vmem:[%s647_s29] sm:$0x7]  ;;  %v71_v3 = vsel %vm69_vm0, %v64_v0, 0 }
   0xb   :  { %v93_v4 = vsel %vm91_vm1, %v63_v1, 0  ;;  %80 = vmatpush.bf16.msra.mxu0 %v71_v3  ;;  %v126_v24 = vsub.f32 1.0, %v125_v23  ;;  %v432_v0 = vld [vmem:[%s632_s6] ss:$0 sm:$0xff] }
   0xc   :  { %102 = vmatpush.bf16.msra.mxu1 %v93_v4 }
   0xd   :  { %v127_v25 = vmul.f32 %v440_v22, %v126_v24 }
   0xe   :  { %405 = vmatmul.msk.bf16.vlgmr.msra.gmra.mxu0 %vm65_vm2, %v62_v8 }
   0xf   :  { %406 = vmatmul.msk.bf16.vlgmr.msra.gmra.mxu1 %vm87_vm3, %v59_v9  ;;  %v128_v26 = vadd.f32 %v440_v22, %v127_v25 }
  0x11   :  { %v130_v27 = vsel %vm129_vm5, %v440_v22, %v128_v26  ;;  %vm309_vm5 = vcmask 64512  }
  0x8b   :  { %v82_v11 = vpop.f32.mrf.mxu0 }
  0x8c   :  { %v104_v12 = vpop.f32.mrf.mxu1 }
  0x8d   :  { %v105_v13 = vadd.f32 %v104_v12, %v82_v11 }
  0x8f   :  { %v113_v14 = vadd.f32 %v430_v10, %v105_v13 }
  0x91   :  { %v118_v15 = vsel %vm117_vm4, %v113_v14, 0.0 }
  0x92   :  { %119 = vadd.xlane.f32.xlu0 %v118_v15 }
  0x93   :  { %v84_v16 = vpop.f32.mrf.mxu0 }
  0x94   :  { %v106_v17 = vpop.f32.mrf.mxu1 }
  0x95   :  { %v107_v18 = vadd.f32 %v106_v17, %v84_v16 }
  0x97   :  { %v114_v19 = vadd.f32 %v430_v10, %v107_v18  ;;  %v427_v10 = vld [vmem:[%s638_s11] sm:$0xff] }
  0x98   :  { %300 = vmatpush.bf16.msrb.mxu0 %v427_v10 }
  0x99   :  { %v121_v20 = vsel %vm117_vm4, %v114_v19, 0.0 }
  0x9a   :  { %122 = vadd.xlane.f32.xlu0 %v121_v20 }
 0x105   :  { %v120_v28 = vpop.xlane.xlu0 %119 }
 0x106   :  { %v131_v29 = vmul.f32 %v130_v27, %v120_v28 }
 0x108   :  { %v133_v30 = vsub.f32 %v113_v14, %v131_v29 }
 0x10a   :  { %v135_v31 = vmul.f32 %v133_v30, %v133_v30 }
 0x10c   :  { %v137_v32 = vsel %vm117_vm4, %v135_v31, 0.0 }
 0x10d   :  { %138 = vadd.xlane.f32.xlu1 %v137_v32  ;;  %v123_v33 = vpop.xlane.xlu0 %122 }
 0x10e   :  { %v132_v34 = vmul.f32 %v130_v27, %v123_v33 }
 0x110   :  { %v134_v35 = vsub.f32 %v114_v19, %v132_v34  ;;  %v434_v34 = vld [vmem:[%s636_s10] ss:$0 sm:$0xff] }
 0x112   :  { %v136_v36 = vmul.f32 %v134_v35, %v134_v35 }
 0x114   :  { %v140_v37 = vsel %vm117_vm4, %v136_v36, 0.0 }
 0x115   :  { %141 = vadd.xlane.f32.xlu1 %v140_v37 }
 0x180   :  { %v139_v40 = vpop.xlane.xlu1 %138 }
 0x181   :  { %v143_v41 = vmul.f32 %v139_v40, %v130_v27 }
 0x183   :  { %v145_v42 = vadd.f32 1e-05, %v143_v41 }
 0x185   :  { %441 = vrsqrt.f32 %v145_v42  ;;  %vm153_vm7 = vweird.f32 %v145_v42 }
 0x188   :  { %v142_v43 = vpop.xlane.xlu1 %141 }
 0x189   :  { %v144_v44 = vmul.f32 %v142_v43, %v130_v27 }
 0x18b   :  { %v442_v45 = vpop.eup %441  ;;  %v146_v46 = vadd.f32 1e-05, %v144_v44 }
 0x18c   :  { %v148_v47 = vmul.f32 %v442_v45, %v145_v42  ;;  %vm154_vm6 = vweird.f32 %v442_v45 }
 0x18d   :  { %443 = vrsqrt.f32 %v146_v46  ;;  %vm155_vm8 = vmor %vm153_vm7, %vm154_vm6  ;;  %vm163_vm10 = vweird.f32 %v146_v46  ;;  %vm380_vm6 = vcmask 1043456  }
 0x18e   :  { %v149_v48 = vmul.f32 %v442_v45, %v148_v47  ;;  %v435_v47 = vld [vmem:[%s637_s12] ss:$0 sm:$0xff] }
 0x190   :  { %v150_v49 = vmul.f32 0.5, %v149_v48 }
 0x192   :  { %v151_v50 = vsub.f32 1.5, %v150_v49 }
 0x193   :  { %v444_v51 = vpop.eup %443 }
 0x194   :  { %v152_v52 = vmul.f32 %v442_v45, %v151_v50  ;;  %v158_v53 = vmul.f32 %v444_v51, %v146_v46  ;;  %vm164_vm9 = vweird.f32 %v444_v51 }
 0x195   :  { %vm165_vm11 = vmor %vm163_vm10, %vm164_vm9 }
 0x196   :  { %v159_v54 = vmul.f32 %v444_v51, %v158_v53  ;;  %v156_v55 = vsel %vm155_vm8, %v442_v45, %v152_v52 }
 0x197   :  { %v167_v58 = vmul.f32 %v156_v55, %v133_v30 }
 0x198   :  { %v160_v56 = vmul.f32 0.5, %v159_v54  ;;  %v460_v54 = vmov 8.0  }
 0x199   :  { %v172_v63 = vmul.f32 %v431_v59, %v167_v58 }
 0x19a   :  { %v161_v57 = vsub.f32 1.5, %v160_v56 }
 0x19b   :  { %v177_v2 = vadd.f32 %v432_v0, %v172_v63 }
 0x19c   :  { %v162_v60 = vmul.f32 %v444_v51, %v161_v57 }
 0x19e   :  { %v166_v61 = vsel %vm165_vm11, %v444_v51, %v162_v60 }
 0x19f   :  { %v168_v62 = vmul.f32 %v166_v61, %v134_v35 }
 0x1a1   :  { %v173_v1 = vmul.f32 %v431_v59, %v168_v62 }
 0x1a3   :  { %v178_v3 = vadd.f32 %v432_v0, %v173_v1 }
 0x1a5   :  { %v179_v4 = vpack.c.bf16 %v178_v3, %v177_v2 }
 0x1a7   :  { %411 = vmatmul.msk.bf16.vlgmr.msra.gmra.mxu2 %vm117_vm4, %v179_v4  ;;  %416 = vmatmul.msk.bf16.vlgmr.msra.gmra.mxu3 %vm117_vm4, %v179_v4 }
 0x22a   :  { %v204_v6 = vpop.f32.mrf.mxu2  ;;  %v230_v21 = vpop.f32.mrf.mxu3 }
 0x22b   :  { %v205_v7 = vadd.f32 %v433_v5, %v204_v6  ;;  %v231_v41 = vadd.f32 %v434_v34, %v230_v21 }
 0x22d   :  { %v417_v8 = vmul.f32 -1.442695, %v205_v7 }
 0x22f   :  { %445 = vpow2.f32 %v417_v8 }
 0x232   :  { %v206_v9 = vpop.f32.mrf.mxu2  ;;  %v232_v37 = vpop.f32.mrf.mxu3 }
 0x233   :  { %v207_v11 = vadd.f32 %v433_v5, %v206_v9  ;;  %v233_v43 = vadd.f32 %v434_v34, %v232_v37 }
 0x235   :  { %v446_v12 = vpop.eup %445  ;;  %v418_v13 = vmul.f32 -1.442695, %v207_v11 }
 0x236   :  { %v241_v14 = vadd.f32 1.0, %v446_v12 }
 0x237   :  { %447 = vpow2.f32 %v418_v13 }
 0x238   :  { %449 = vrcp.f32 %v241_v14  ;;  %v254_v24 = vand.u32 2147483648, %v241_v14  ;;  %vm248_vm13 = vweird.f32 %v241_v14  ;;  %v252_v25 = vand.u32 2147483647, %v241_v14 }
 0x23a   :  { %v255_v29 = vor.u32 1.1754944e-38, %v254_v24  ;;  %vm253_vm15 = vcmp.eq.f32.partialorder %v252_v25, 8.507059e+37 }
 0x23d   :  { %v448_v15 = vpop.eup %447 }
 0x23e   :  { %v450_v16 = vpop.eup %449  ;;  %v242_v17 = vadd.f32 1.0, %v448_v15 }
 0x23f   :  { %v244_v18 = vmul.f32 %v450_v16, %v241_v14  ;;  %vm249_vm12 = vweird.f32 %v450_v16 }
 0x240   :  { %451 = vrcp.f32 %v242_v17  ;;  %vm250_vm14 = vmor %vm248_vm13, %vm249_vm12  ;;  %v269_v30 = vand.u32 2147483648, %v242_v17  ;;  %v267_v32 = vand.u32 2147483647, %v242_v17  ;;  %vm263_vm1 = vweird.f32 %v242_v17 }
 0x241   :  { %v245_v19 = vsub.f32 1.0, %v244_v18  ;;  %453 = vrcp.f32 %v460_v54  ;;  %vm398_vm13 = vcmask 31744  }
 0x242   :  { %v270_v36 = vor.u32 1.1754944e-38, %v269_v30  ;;  %vm268_vm3 = vcmp.eq.f32.partialorder %v267_v32, 8.507059e+37 }
 0x243   :  { %v246_v20 = vmul.f32 %v450_v16, %v245_v19 }
 0x245   :  { %v247_v22 = vadd.f32 %v450_v16, %v246_v20 }
 0x246   :  { %v452_v23 = vpop.eup %451 }
 0x247   :  { %v259_v26 = vmul.f32 %v452_v23, %v242_v17  ;;  %v251_v27 = vsel %vm250_vm14, %v450_v16, %v247_v22  ;;  %vm264_vm0 = vweird.f32 %v452_v23  ;;  %v454_v55 = vpop.eup %453 }
 0x248   :  { %v256_v33 = vsel %vm253_vm15, %v255_v29, %v251_v27  ;;  %vm265_vm2 = vmor %vm263_vm1, %vm264_vm0  ;;  %v317_v56 = vmul.f32 8.0, %v454_v55 }
 0x249   :  { %v260_v28 = vsub.f32 1.0, %v259_v26  ;;  %v273_v38 = vmul.f32 %v256_v33, %v205_v7  ;;  %v372_v7 = vld [vmem:[%s642_s15] sm:$0xf] }
 0x24a   :  { %v318_v57 = vsub.f32 1.0, %v317_v56  ;;  %v382_v9 = vsel %vm380_vm6, %v372_v7, 0  ;;  %v437_v33 = vld [vmem:[%s640_s14] ss:$0 sm:$0xff] }
 0x24b   :  { %v261_v31 = vmul.f32 %v452_v23, %v260_v28  ;;  %v275_v44 = vmul.f32 %v273_v38, %v231_v41  ;;  %391 = vmatpush.bf16.msrb.mxu1 %v382_v9  ;;  %v436_v28 = vld [vmem:[%s639_s13] ss:$0 sm:$0xff] }
 0x24c   :  { %v319_v58 = vmul.f32 %v454_v55, %v318_v57  ;;  %v438_v38 = vld [vmem:[%s641_s16] ss:$0 sm:$0xff] }
 0x24d   :  { %v262_v35 = vadd.f32 %v452_v23, %v261_v31 }
 0x24e   :  { %v320_v59 = vadd.f32 %v454_v55, %v319_v58 }
 0x24f   :  { %v266_v39 = vsel %vm265_vm2, %v452_v23, %v262_v35 }
 0x250   :  { %v271_v40 = vsel %vm268_vm3, %v270_v36, %v266_v39 }
 0x251   :  { %v274_v42 = vmul.f32 %v271_v40, %v207_v11 }
 0x253   :  { %v276_v45 = vmul.f32 %v274_v42, %v233_v43 }
 0x255   :  { %v277_v46 = vpack.c.bf16 %v276_v45, %v275_v44 }
 0x257   :  { %423 = vmatmul.msk.bf16.vlgmr.msrb.gmra.mxu0 %vm117_vm4, %v277_v46  ;;  %vm321_vm4 = vweird.f32 %v454_v55 }
 0x258   :  { %v322_v60 = vsel %vm321_vm4, %v454_v55, %v320_v59 }
 0x2d4   :  { %v302_v48 = vpop.f32.mrf.mxu0 }
 0x2d5   :  { %v303_v49 = vadd.f32 %v435_v47, %v302_v48 }
 0x2d7   :  { %v310_v50 = vsel %vm309_vm5, %v303_v49, 0.0 }
 0x2d8   :  { %311 = vadd.xlane.f32.xlu2 %v310_v50 }
 0x2dc   :  { %v304_v51 = vpop.f32.mrf.mxu0 }
 0x2dd   :  { %v305_v52 = vadd.f32 %v435_v47, %v304_v51 }
 0x2df   :  { %v313_v53 = vsel %vm309_vm5, %v305_v52, 0.0 }
 0x2e0   :  { %314 = vadd.xlane.f32.xlu2 %v313_v53 }
 0x34b   :  { %v312_v61 = vpop.xlane.xlu2 %311 }
 0x34c   :  { %v323_v62 = vmul.f32 %v322_v60, %v312_v61 }
 0x34e   :  { %v325_v63 = vsub.f32 %v303_v49, %v323_v62 }
 0x350   :  { %v327_v0 = vmul.f32 %v325_v63, %v325_v63 }
 0x352   :  { %v329_v1 = vsel %vm309_vm5, %v327_v0, 0.0 }
 0x353   :  { %330 = vadd.xlane.f32.xlu0 %v329_v1  ;;  %v315_v2 = vpop.xlane.xlu2 %314 }
 0x354   :  { %v324_v3 = vmul.f32 %v322_v60, %v315_v2 }
 0x356   :  { %v326_v4 = vsub.f32 %v305_v52, %v324_v3 }
 0x358   :  { %v328_v5 = vmul.f32 %v326_v4, %v326_v4 }
 0x35a   :  { %v332_v6 = vsel %vm309_vm5, %v328_v5, 0.0 }
 0x35b   :  { %333 = vadd.xlane.f32.xlu1 %v332_v6 }
 0x3c6   :  { %v331_v8 = vpop.xlane.xlu0 %330 }
 0x3c7   :  { %v335_v10 = vmul.f32 %v331_v8, %v322_v60 }
 0x3c9   :  { %v337_v11 = vadd.f32 1e-05, %v335_v10 }
 0x3cb   :  { %455 = vrsqrt.f32 %v337_v11  ;;  %vm345_vm8 = vweird.f32 %v337_v11 }
 0x3ce   :  { %v334_v12 = vpop.xlane.xlu1 %333 }
 0x3cf   :  { %v336_v13 = vmul.f32 %v334_v12, %v322_v60 }
 0x3d1   :  { %v456_v14 = vpop.eup %455  ;;  %v338_v15 = vadd.f32 1e-05, %v336_v13 }
 0x3d2   :  { %v340_v16 = vmul.f32 %v456_v14, %v337_v11  ;;  %vm346_vm7 = vweird.f32 %v456_v14 }
 0x3d3   :  { %457 = vrsqrt.f32 %v338_v15  ;;  %vm347_vm9 = vmor %vm345_vm8, %vm346_vm7  ;;  %vm355_vm11 = vweird.f32 %v338_v15 }
 0x3d4   :  { %v341_v17 = vmul.f32 %v456_v14, %v340_v16 }
 0x3d6   :  { %v342_v18 = vmul.f32 0.5, %v341_v17 }
 0x3d8   :  { %v343_v19 = vsub.f32 1.5, %v342_v18 }
 0x3d9   :  { %v458_v20 = vpop.eup %457 }
 0x3da   :  { %v344_v21 = vmul.f32 %v456_v14, %v343_v19  ;;  %v350_v22 = vmul.f32 %v458_v20, %v338_v15  ;;  %vm356_vm10 = vweird.f32 %v458_v20 }
 0x3db   :  { %vm357_vm12 = vmor %vm355_vm11, %vm356_vm10 }
 0x3dc   :  { %v351_v23 = vmul.f32 %v458_v20, %v350_v22  ;;  %v348_v24 = vsel %vm347_vm9, %v456_v14, %v344_v21 }
 0x3dd   :  { %v359_v27 = vmul.f32 %v348_v24, %v325_v63 }
 0x3de   :  { %v352_v25 = vmul.f32 0.5, %v351_v23 }
 0x3df   :  { %v364_v32 = vmul.f32 %v436_v28, %v359_v27 }
 0x3e0   :  { %v353_v26 = vsub.f32 1.5, %v352_v25 }
 0x3e1   :  { %v369_v35 = vadd.f32 %v437_v33, %v364_v32 }
 0x3e2   :  { %v354_v29 = vmul.f32 %v458_v20, %v353_v26 }
 0x3e4   :  { %v358_v30 = vsel %vm357_vm12, %v458_v20, %v354_v29 }
 0x3e5   :  { %v360_v31 = vmul.f32 %v358_v30, %v326_v4 }
 0x3e7   :  { %v365_v34 = vmul.f32 %v436_v28, %v360_v31 }
 0x3e9   :  { %v370_v36 = vadd.f32 %v437_v33, %v365_v34 }
 0x3eb   :  { %v371_v37 = vpack.c.bf16 %v370_v36, %v369_v35 }
 0x3ed   :  { %424 = vmatmul.msk.bf16.vlgmr.msrb.gmra.mxu1 %vm309_vm5, %v371_v37 }
 0x46a   :  { %v393_v39 = vpop.f32.mrf.mxu1 }
 0x46b   :  { %v394_v40 = vadd.f32 %v438_v38, %v393_v39 }
 0x46d   :  { %399 = vst.msk [vmem:[%s643_s17] sm:$0xff] %vm398_vm13, %v394_v40 }
 0x472   :  { %v395_v41 = vpop.f32.mrf.mxu1 }
 0x473   :  { %v396_v42 = vadd.f32 %v438_v38, %v395_v41 }
 0x475   :  { %400 = vst.msk [vmem:[%s643_s17 + $0x8] sm:$0xff] %vm398_vm13, %v396_v42 }

</bundles_post_ra>
